<compile_context>
chip_gen: v7x
topology: tpu7x:2x2x1
jax: 0.10.0
libtpu: 0.0.40
codegen_flags: <defaults>
</compile_context>

<pallas_src>
import functools

import jax
import jax.numpy as jnp
from jax.experimental import pallas as pl
from jax.experimental.pallas import tpu as pltpu


# ----------------------------- Pallas kernel --------------------------------

def _gate_mlp_kernel(x_ref, w1_ref, b1_ref, w2_ref, b2_ref, o_ref):
    """Fused fc1 + (dropout=identity) + ReLU + fc2 + sigmoid for one batch tile.

    x_ref : (Bt, Din)   f32/native   flattened input rows (cast to bf16 here)
    w1_ref: (Din, Hp)   bf16         fc1 weight, hidden zero-padded to 128 lanes
    b1_ref: (1, Hp)     f32
    w2_ref: (Hp, Op)    bf16         fc2 weight, output zero-padded to 128 lanes
    b2_ref: (1, Op)     f32
    o_ref : (Bt, Op)    bf16         lane-dense output
    """
    # In-VMEM cast to the MXU dtype (free; avoids a separate XLA convert pass
    # over the whole input in HBM).
    x = x_ref[...].astype(w1_ref.dtype)
    # fc1: bf16 operands on the MXU, f32 accumulation.
    h = jnp.dot(x, w1_ref[...], preferred_element_type=jnp.float32) + b1_ref[...]
    # TODO(synk): nn.Dropout() training-mode masking is not implemented;
    # eval-mode identity semantics only (dropout precedes ReLU in torch).
    h = jnp.maximum(h, 0.0)                       # ReLU in f32 on the VPU
    # fc2: cast f32 activations to bf16 for the MXU, accumulate in f32.
    y = jnp.dot(h.astype(w2_ref.dtype), w2_ref[...],
                preferred_element_type=jnp.float32) + b2_ref[...]
    # Exact sigmoid in f32 (exp on the EUP + exact divide; ample slot slack).
    o_ref[...] = (1.0 / (1.0 + jnp.exp(-y))).astype(o_ref.dtype)


# ------------------------------ wrappers -------------------------------------

def _round_up(n, m):
    return (n + m - 1) // m * m


def _round_down(n, m):
    return (n // m) * m


def _num_tensorcores_per_chip():
    """2 TensorCores/chip on v7x; 1 on v5e/v6e (best-effort detection)."""
    try:
        kind = jax.devices()[0].device_kind.lower()
    except Exception:
        return 1
    return 2 if ("v7" in kind or "7x" in kind) else 1


_MAX_BLOCK_B = 1024            # 1024x1024 f32 x-tile = 4 MiB; x2 buffers = 8 MiB VMEM
_GRIDLESS_MAX_BYTES = 8 << 20  # single-TC chips: stay grid-less below this


def _select_block_b(bsz, dim_in, itemsize, num_tc):
    """None => grid-less single resident block; else a 128-multiple batch tile."""
    flat_bytes = bsz * dim_in * itemsize
    if bsz < 2 * 128:
        return None  # cannot give two cores a 128-row tile anyway
    if num_tc >= 2:
        # Guarantee the "parallel" grid axis has >= num_tc steps (both TCs busy).
        per_core = _round_down(bsz // num_tc, 128)
        return max(128, min(_MAX_BLOCK_B, per_core))
    # Single-TC chips (v5e/v6e): tiling only pays once the input no longer
    # comfortably fits as one resident block; otherwise the ~0.35 us per
    # grid-step pipeline overhead dominates the tiny per-tile work.
    if flat_bytes <= _GRIDLESS_MAX_BYTES:
        return None
    return min(_MAX_BLOCK_B, _round_down(bsz, 128))


def prepare_params(w1, b1, w2, b2, compute_dtype=jnp.bfloat16):
    """Cast weights to the MXU dtype and zero-pad hidden/out dims to 128 lanes."""
    dim_in, dim_hidden = w1.shape
    dim_out = w2.shape[1]
    hid_p = _round_up(dim_hidden, 128)
    out_p = _round_up(dim_out, 128)
    w1p = jnp.zeros((dim_in, hid_p), compute_dtype).at[:, :dim_hidden].set(
        w1.astype(compute_dtype))
    b1p = jnp.zeros((1, hid_p), jnp.float32).at[:, :dim_hidden].set(b1)
    w2p = jnp.zeros((hid_p, out_p), compute_dtype).at[:dim_hidden, :dim_out].set(
        w2.astype(compute_dtype))
    b2p = jnp.zeros((1, out_p), jnp.float32).at[:, :dim_out].set(b2)
    return w1p, b1p, w2p, b2p


@functools.partial(jax.jit, static_argnames=("dim_out", "out_dtype"))
def gate_mlp_forward(x, w1p, b1p, w2p, b2p, *, dim_out, out_dtype=jnp.bfloat16):
    """GateMLP forward for x of shape (B, C, H, W); one fused Pallas kernel."""
    bsz = x.shape[0]
    # torch: x.view(-1, C*H*W) on a contiguous NCHW tensor == plain reshape.
    flat = x.reshape(bsz, -1)               # native dtype; bf16 cast is in-kernel
    dim_in = flat.shape[1]
    assert dim_in == w1p.shape[0], (dim_in, w1p.shape)
    hid_p, out_p = w1p.shape[1], w2p.shape[1]

    block_b = _select_block_b(bsz, dim_in, flat.dtype.itemsize,
                              _num_tensorcores_per_chip())

    if block_b is None:
        # Small batch / single-TC: one grid-less block, everything resident.
        vmem = pl.BlockSpec(memory_space=pltpu.MemorySpace.VMEM)
        out = pl.pallas_call(
            _gate_mlp_kernel,
            out_shape=jax.ShapeDtypeStruct((bsz, out_p), out_dtype),
            in_specs=[vmem] * 5,
            out_specs=vmem,
        )(flat, w1p, b1p, w2p, b2p)
    else:
        # Batch-tiled path with a cdiv grid (handles bsz % block_b != 0: the
        # last block's OOB input rows only feed OOB output rows, whose writes
        # are dropped).  The "parallel" axis shards tiles across TensorCores
        # on v7x; weights stay resident (index_map -> (0, 0) every step).
        out = pl.pallas_call(
            _gate_mlp_kernel,
            out_shape=jax.ShapeDtypeStruct((bsz, out_p), out_dtype),
            grid=(pl.cdiv(bsz, block_b),),
            in_specs=[
                pl.BlockSpec((block_b, dim_in), lambda i: (i, 0)),
                pl.BlockSpec((dim_in, hid_p), lambda i: (0, 0)),
                pl.BlockSpec((1, hid_p), lambda i: (0, 0)),
                pl.BlockSpec((hid_p, out_p), lambda i: (0, 0)),
                pl.BlockSpec((1, out_p), lambda i: (0, 0)),
            ],
            out_specs=pl.BlockSpec((block_b, out_p), lambda i: (i, 0)),
            compiler_params=pltpu.CompilerParams(
                dimension_semantics=("parallel",)),
        )(flat, w1p, b1p, w2p, b2p)

    # The padded, lane-dense buffer could be consumed directly by a fused
    # downstream op; this slice is a tiny (bsz x 128) pass for API fidelity.
    return out[:, :dim_out]


# --------------------------- params & reference ------------------------------

def init_params(key, dim_in, dim_hidden, dim_out):
    """PyTorch nn.Linear default init: U(-1/sqrt(fan_in), 1/sqrt(fan_in))."""
    ks = jax.random.split(key, 4)

    def u(k, shape, fan_in):
        bound = 1.0 / jnp.sqrt(float(fan_in))
        return jax.random.uniform(k, shape, jnp.float32, -bound, bound)

    w1 = u(ks[0], (dim_in, dim_hidden), dim_in)
    b1 = u(ks[1], (dim_hidden,), dim_in)
    w2 = u(ks[2], (dim_hidden, dim_out), dim_hidden)
    b2 = u(ks[3], (dim_out,), dim_hidden)
    return w1, b1, w2, b2


def reference(x, w1, b1, w2, b2):
    """Pure-JAX f32 reference reproducing the PyTorch forward (eval mode)."""
    h = x.reshape(x.shape[0], -1) @ w1 + b1
    h = jnp.maximum(h, 0.0)          # dropout is identity in eval mode
    y = h @ w2 + b2
    return jax.nn.sigmoid(y)


if __name__ == "__main__":
    key = jax.random.PRNGKey(0)
    kx, kp, kx2, kx3 = jax.random.split(key, 4)

    B, C, H, W = 2, 4, 16, 16
    dim_in, dim_hidden, dim_out = C * H * W, 64, 10

    x = jax.random.normal(kx, (B, C, H, W), jnp.float32)
    w1, b1, w2, b2 = init_params(kp, dim_in, dim_hidden, dim_out)
    w1p, b1p, w2p, b2p = prepare_params(w1, b1, w2, b2)

    # Small batch: single fused grid-less kernel.
    out = gate_mlp_forward(x, w1p, b1p, w2p, b2p, dim_out=dim_out)
    out = jax.block_until_ready(out)
    assert out.shape == (B, dim_out), out.shape
    ref = reference(x, w1, b1, w2, b2)
    # bf16 MXU operands (f32 accumulate) + bf16 output store => loose atol.
    err = jnp.max(jnp.abs(out.astype(jnp.float32) - ref))
    assert jnp.allclose(out.astype(jnp.float32), ref, atol=2e-2), float(err)

    # Medium batch: tiled "parallel" grid on v7x (2 TCs), grid-less on v5e/v6e.
    x2 = jax.random.normal(kx2, (256, C, H, W), jnp.float32)
    out2 = jax.block_until_ready(
        gate_mlp_forward(x2, w1p, b1p, w2p, b2p, dim_out=dim_out))
    assert out2.shape == (256, dim_out), out2.shape
    ref2 = reference(x2, w1, b1, w2, b2)
    err2 = jnp.max(jnp.abs(out2.astype(jnp.float32) - ref2))
    assert jnp.allclose(out2.astype(jnp.float32), ref2, atol=2e-2), float(err2)

    # Large, non-divisible batch: exercises the cdiv-grid tiled path (1024-row
    # tiles + a short final tile) on all generations.
    x3 = jax.random.normal(kx3, (2309, C, H, W), jnp.float32)
    out3 = jax.block_until_ready(
        gate_mlp_forward(x3, w1p, b1p, w2p, b2p, dim_out=dim_out))
    assert out3.shape == (2309, dim_out), out3.shape
    ref3 = reference(x3, w1, b1, w2, b2)
    err3 = jnp.max(jnp.abs(out3.astype(jnp.float32) - ref3))
    assert jnp.allclose(out3.astype(jnp.float32), ref3, atol=2e-2), float(err3)

    print("KERNEL_OK")
</pallas_src>

<mosaic_0001>
module attributes {stable_mosaic.version = 11 : i64} {
  func.func @_gate_mlp_kernel(%arg0: memref<2x1024xf32, #tpu.memory_space<vmem>>, %arg1: memref<1024x128xbf16, #tpu.memory_space<vmem>>, %arg2: memref<1x128xf32, #tpu.memory_space<vmem>>, %arg3: memref<128x128xbf16, #tpu.memory_space<vmem>>, %arg4: memref<1x128xf32, #tpu.memory_space<vmem>>, %arg5: memref<2x128xbf16, #tpu.memory_space<vmem>>) attributes {dimension_semantics = [], scalar_prefetch = 0 : i64, scratch_operands = 0 : i64, tpu.core_type = #tpu.core_type<tc>} {
    %c0 = arith.constant 0 : index
    %c0_0 = arith.constant 0 : index
    %0 = vector.load %arg0[%c0, %c0_0] : memref<2x1024xf32, #tpu.memory_space<vmem>>, vector<2x1024xf32>
    %1 = arith.truncf %0 : vector<2x1024xf32> to vector<2x1024xbf16>
    %c0_1 = arith.constant 0 : index
    %c0_2 = arith.constant 0 : index
    %2 = vector.load %arg1[%c0_1, %c0_2] : memref<1024x128xbf16, #tpu.memory_space<vmem>>, vector<1024x128xbf16>
    %cst = arith.constant dense<0.000000e+00> : vector<2x128xf32>
    %3 = tpu.matmul %1, %2, %cst {dimension_numbers = #tpu.dot_dimension_numbers<[1], [0], [0], [1], [0, 0, 1, 1], [], []>} : vector<2x1024xbf16>, vector<1024x128xbf16>, vector<2x128xf32> -> vector<2x128xf32>
    %c0_3 = arith.constant 0 : index
    %c0_4 = arith.constant 0 : index
    %4 = vector.load %arg2[%c0_3, %c0_4] : memref<1x128xf32, #tpu.memory_space<vmem>>, vector<1x128xf32>
    %5 = vector.broadcast %4 : vector<1x128xf32> to vector<2x128xf32>
    %6 = arith.addf %3, %5 : vector<2x128xf32>
    %cst_5 = arith.constant 0.000000e+00 : f32
    %7 = vector.broadcast %cst_5 : f32 to vector<2x128xf32>
    %8 = arith.maximumf %6, %7 : vector<2x128xf32>
    %9 = arith.truncf %8 : vector<2x128xf32> to vector<2x128xbf16>
    %c0_6 = arith.constant 0 : index
    %c0_7 = arith.constant 0 : index
    %10 = vector.load %arg3[%c0_6, %c0_7] : memref<128x128xbf16, #tpu.memory_space<vmem>>, vector<128x128xbf16>
    %cst_8 = arith.constant dense<0.000000e+00> : vector<2x128xf32>
    %11 = tpu.matmul %9, %10, %cst_8 {dimension_numbers = #tpu.dot_dimension_numbers<[1], [0], [0], [1], [0, 0, 1, 1], [], []>} : vector<2x128xbf16>, vector<128x128xbf16>, vector<2x128xf32> -> vector<2x128xf32>
    %c0_9 = arith.constant 0 : index
    %c0_10 = arith.constant 0 : index
    %12 = vector.load %arg4[%c0_9, %c0_10] : memref<1x128xf32, #tpu.memory_space<vmem>>, vector<1x128xf32>
    %13 = vector.broadcast %12 : vector<1x128xf32> to vector<2x128xf32>
    %14 = arith.addf %11, %13 : vector<2x128xf32>
    %cst_11 = arith.constant 0.000000e+00 : f32
    %15 = vector.broadcast %cst_11 : f32 to vector<2x128xf32>
    %16 = arith.subf %15, %14 : vector<2x128xf32>
    %17 = math.exp %16 : vector<2x128xf32>
    %cst_12 = arith.constant 1.000000e+00 : f32
    %18 = vector.broadcast %cst_12 : f32 to vector<2x128xf32>
    %19 = arith.addf %18, %17 : vector<2x128xf32>
    %cst_13 = arith.constant 1.000000e+00 : f32
    %20 = vector.broadcast %cst_13 : f32 to vector<2x128xf32>
    %21 = arith.divf %20, %19 : vector<2x128xf32>
    %22 = arith.truncf %21 : vector<2x128xf32> to vector<2x128xbf16>
    %c0_14 = arith.constant 0 : index
    %c0_15 = arith.constant 0 : index
    %23 = vector.load %arg5[%c0_14, %c0_15] : memref<2x128xbf16, #tpu.memory_space<vmem>>, vector<2x128xbf16>
    tpu.vector_store %arg5[%c0_14, %c0_15], %22 {strides = array<i32>} : memref<2x128xbf16, #tpu.memory_space<vmem>>, vector<2x128xbf16>,
    return
  }
}

</mosaic_0001>

<bundles_post_ra>
// kernel: gate_mlp_forward.1
= control target key start
LH: loop header
LB: loop body
LE: loop exit
PB: predicated region body
PF: predicated region fallthrough
CT: control target
= control target key end

     0   :  { %10 = vsyncpa [#allocation3], 0  ;;  %s1332_s0 = inlined_call_operand.vmem [shape: f32[2,1024], index: 0, kind: input, shape index: {}]   ;;  %s1333_s1 = inlined_call_operand.hbm [shape: bf16[1024,128], index: 1, kind: input, shape index: {}]   ;;  %s1334_s2 = inlined_call_operand.vmem [shape: f32[1,128], index: 2, kind: input, shape index: {}]   ;;  %s1335_s3 = inlined_call_operand.vmem [shape: bf16[128,128], index: 3, kind: input, shape index: {}]   ;;  %s1336_s4 = inlined_call_operand.vmem [shape: f32[1,128], index: 4, kind: input, shape index: {}]   ;;  %s1337_s5 = inlined_call_operand.hbm [shape: bf16[2,128], index: 5, kind: output, shape index: {}]  }
   0x1   :  { %11 = vsyncpa [#allocation4], 0  ;;  %s1229_s18 = smov [#allocation2]   ;;  %s1181_s22 = scalar_lea.hbm %s1333_s1, 8192 }
   0x2   :  { %s19_s19 = sshll.u32 %s1229_s18, 4  ;;  %p1182_p0 = scmp.ne.s32.totalorder %s1333_s1, %s1181_s22  ;;  %s20_s19 = int_to_ptr.vmem [resolvable:$true] %s19_s19 }
   0x3   :  { %p1185_p1 = scmp.lt.u32.totalorder %s1181_s22, %s1333_s1 }
   0x5   :  { %p1187_p2 = pnand %p1185_p1, %p1182_p0 }
   0x7   :  { %1190 = shalt.err (!%p1187_p2)
}
   0x8   :  { %s1191_s27 = scalar_lea.vmem %s20_s19, 8192  ;;  %p1196_p4 = scmp.lt.s32.totalorder %s20_s19, %s20_s19 }
   0x9   :  { %p1192_p3 = scmp.ne.s32.totalorder %s20_s19, %s1191_s27  ;;  %p1197_p5 = scmp.lt.s32.totalorder %s1191_s27, %s1191_s27 }
   0xb   :  { %p1198_p6 = por %p1197_p5, %p1196_p4 }
   0xd   :  { %p1199_p7 = pnand %p1198_p6, %p1192_p3 }
   0xf   :  { %1202 = shalt.err (!%p1199_p7)
}
  0x10   :  { %s1230_s28 = smov 64   ;;  %s1231_s29 = smov 4  }
  0x11   :  { %25 = dma.hbm_to_vmem [thread:$0]  %s1333_s1, 8192, %s20_s19, [#allocation3], %s1230_s28, %s1230_s28, %s1231_s29  }
  0x12   :  { %1225 = dma.done.wait [#allocation3], 8192  }
  0x13   :  { %1226 = vsyncadd [#allocation3], 4294959104  ;;  %v1103_v0 = vld [vmem:[#allocation2 + $0x40] sm:$0xff]   ;;  %v1107_v4 = vld [vmem:[#allocation2 + $0x48] sm:$0xff]   ;;  %v1232_v22 = vmov 1983009808   ;;  %v44_v24 = vlaneseq }
  0x14   :  { %v1104_v1 = vld [vmem:[#allocation2 + $0xc0] sm:$0xff]   ;;  %979 = vmatprep.subr.bf16.mxu0 %v1103_v0  ;;  %v1108_v5 = vld [vmem:[#allocation2 + $0xc8] sm:$0xff]   ;;  %v1111_v8 = vld [vmem:[#allocation2 + $0x50] sm:$0xff]   ;;  %v42_v23 = vunpack.c.l.s4 %v1232_v22  ;;  %vm1234_vm0 = vmmov 0   ;;  %s1235_s27 = smov [#allocation5]  }
  0x15   :  { %v1105_v2 = vld [vmem:[#allocation2] sm:$0xff]   ;;  %1001 = vmatprep.subr.bf16.mxu1 %v1104_v1  ;;  %v1109_v6 = vld [vmem:[#allocation2 + $0x8] sm:$0xff]   ;;  %v1112_v9 = vld [vmem:[#allocation2 + $0xd0] sm:$0xff]   ;;  %v45_v30 = vshrl.u32 %v44_v24, 7  ;;  %s896_s28 = sshll.u32 %s1235_s27, 4  ;;  %s897_s28 = int_to_ptr.vmem [resolvable:$true] %s896_s28 }
  0x16   :  { %v1106_v3 = vld [vmem:[#allocation2 + $0x80] sm:$0xff]   ;;  %980 = vmatpush3.bf16.msra.mxu0 %v1105_v2  ;;  %v1110_v7 = vld [vmem:[#allocation2 + $0x88] sm:$0xff]   ;;  %v1113_v10 = vld [vmem:[#allocation2 + $0x10] sm:$0xff]   ;;  %v43_v29 = vunpack.c.0.s8 %v42_v23  ;;  %s1203_s29 = scalar_lea.vmem %s897_s28, 16  ;;  %p1208_p9 = scmp.lt.s32.totalorder %s897_s28, %s897_s28 }
  0x17   :  { %1002 = vmatpush3.bf16.msra.mxu1 %v1106_v3  ;;  %981 = vmatprep.subr.bf16.mxu0 %v1107_v4  ;;  %v1114_v11 = vld [vmem:[#allocation2 + $0x90] sm:$0xff]   ;;  %v1115_v12 = vld [vmem:[#allocation2 + $0x58] sm:$0xff]   ;;  %v1119_v16 = vld [vmem:[#allocation2 + $0x60] sm:$0xff]   ;;  %p1204_p8 = scmp.ne.s32.totalorder %s897_s28, %s1203_s29 }
  0x18   :  { %1003 = vmatprep.subr.bf16.mxu1 %v1108_v5  ;;  %v1116_v13 = vld [vmem:[#allocation2 + $0xd8] sm:$0xff]   ;;  %v1120_v17 = vld [vmem:[#allocation2 + $0xe0] sm:$0xff]   ;;  %v1123_v20 = vld [vmem:[#allocation2 + $0x68] sm:$0xff]   ;;  %v1278_v35 = vsub.s32 %v43_v29, %v45_v30 }
  0x19   :  { %v1117_v14 = vld [vmem:[#allocation2 + $0x18] sm:$0xff]   ;;  %v1121_v18 = vld [vmem:[#allocation2 + $0x20] sm:$0xff]   ;;  %v1124_v21 = vld [vmem:[#allocation2 + $0xe8] sm:$0xff]  }
  0x1a   :  { %982 = vmatpush3.bf16.msra.mxu0 %v1109_v6  ;;  %v1118_v15 = vld [vmem:[#allocation2 + $0x98] sm:$0xff]   ;;  %v1122_v19 = vld [vmem:[#allocation2 + $0xa0] sm:$0xff]   ;;  %v1125_v25 = vld [vmem:[#allocation2 + $0x28] sm:$0xff]  }
  0x1b   :  { %1004 = vmatpush3.bf16.msra.mxu1 %v1110_v7  ;;  %983 = vmatprep.subr.bf16.mxu0 %v1111_v8  ;;  %v1126_v26 = vld [vmem:[#allocation2 + $0xa8] sm:$0xff]   ;;  %v1127_v27 = vld [vmem:[#allocation2 + $0x70] sm:$0xff]   ;;  %v1131_v33 = vld [vmem:[#allocation2 + $0x78] sm:$0xff]  }
  0x1c   :  { %1005 = vmatprep.subr.bf16.mxu1 %v1112_v9  ;;  %v1128_v28 = vld [vmem:[#allocation2 + $0xf0] sm:$0xff]   ;;  %v1132_v34 = vld [vmem:[#allocation2 + $0xf8] sm:$0xff]   ;;  %v36_v38 = vld [vmem:[%s1332_s0] sm:$0xff] }
  0x1d   :  { %v1129_v31 = vld [vmem:[#allocation2 + $0x30] sm:$0xff]   ;;  %v1133_v36 = vld [vmem:[#allocation2 + $0x38] sm:$0xff]   ;;  %v47_v39 = vrot.slane %v36_v38, %v1278_v35  ;;  %v40_v40 = vcombine.high %v36_v38, %v36_v38  ;;  %v1136_v41 = vld [vmem:[#allocation2 + $0x140] sm:$0xff]  }
  0x1e   :  { %984 = vmatpush3.bf16.msra.mxu0 %v1113_v10  ;;  %v1130_v32 = vld [vmem:[#allocation2 + $0xb0] sm:$0xff]   ;;  %v1134_v37 = vld [vmem:[#allocation2 + $0xb8] sm:$0xff]   ;;  %v1137_v42 = vld [vmem:[#allocation2 + $0x1c0] sm:$0xff]  }
  0x1f   :  { %1006 = vmatpush3.bf16.msra.mxu1 %v1114_v11  ;;  %985 = vmatprep.subr.bf16.mxu0 %v1115_v12  ;;  %v55_v43 = vcombine.high %v47_v39, %v47_v39  ;;  %v54_v44 = vrot.slane %v40_v40, %v1278_v35  ;;  %v82_v45 = vpack.c.bf16 %v47_v39, %v47_v39  ;;  %v1138_v46 = vld [vmem:[#allocation2 + $0x100] sm:$0xff]   ;;  %v1140_v51 = vld [vmem:[#allocation2 + $0x148] sm:$0xff]   ;;  %v1144_v56 = vld [vmem:[#allocation2 + $0x150] sm:$0xff]  }
  0x20   :  { %1007 = vmatprep.subr.bf16.mxu1 %v1116_v13  ;;  %v1139_v49 = vld [vmem:[#allocation2 + $0x180] sm:$0xff]   ;;  %v1141_v53 = vld [vmem:[#allocation2 + $0x1c8] sm:$0xff]   ;;  %v1145_v57 = vld [vmem:[#allocation2 + $0x1d0] sm:$0xff]  }
  0x21   :  { %v83_v47 = vpack.c.bf16 %v55_v43, %v55_v43  ;;  %v56_v48 = vcombine.high %v54_v44, %v54_v44  ;;  %v84_v50 = vpack.c.bf16 %v54_v44, %v54_v44  ;;  %v1142_v54 = vld [vmem:[#allocation2 + $0x108] sm:$0xff]   ;;  %v1146_v58 = vld [vmem:[#allocation2 + $0x110] sm:$0xff]   ;;  %v1148_v60 = vld [vmem:[#allocation2 + $0x158] sm:$0xff]  }
  0x22   :  { %986 = vmatpush3.bf16.msra.mxu0 %v1117_v14  ;;  %v1143_v55 = vld [vmem:[#allocation2 + $0x188] sm:$0xff]   ;;  %v1147_v59 = vld [vmem:[#allocation2 + $0x190] sm:$0xff]   ;;  %v1149_v61 = vld [vmem:[#allocation2 + $0x1d8] sm:$0xff]  }
  0x23   :  { %1008 = vmatpush3.bf16.msra.mxu1 %v1118_v15  ;;  %987 = vmatprep.subr.bf16.mxu0 %v1119_v16  ;;  %v85_v52 = vpack.c.bf16 %v56_v48, %v56_v48  ;;  %v1150_v62 = vld [vmem:[#allocation2 + $0x118] sm:$0xff]   ;;  %v1152_v0 = vld [vmem:[#allocation2 + $0x160] sm:$0xff]   ;;  %v1156_v4 = vld [vmem:[#allocation2 + $0x168] sm:$0xff]  }
  0x24   :  { %1009 = vmatprep.subr.bf16.mxu1 %v1120_v17  ;;  %641 = vmatprep.mubr.bf16.mxu0 %v83_v47  ;;  %v1151_v63 = vld [vmem:[#allocation2 + $0x198] sm:$0xff]   ;;  %v1153_v1 = vld [vmem:[#allocation2 + $0x1e0] sm:$0xff]   ;;  %v1157_v5 = vld [vmem:[#allocation2 + $0x1e8] sm:$0xff]  }
  0x25   :  { %681 = vmatprep.mubr.bf16.mxu1 %v85_v52  ;;  %v1154_v2 = vld [vmem:[#allocation2 + $0x120] sm:$0xff]   ;;  %v1158_v6 = vld [vmem:[#allocation2 + $0x128] sm:$0xff]   ;;  %v1160_v8 = vld [vmem:[#allocation2 + $0x170] sm:$0xff]  }
  0x26   :  { %988 = vmatpush3.bf16.msra.mxu0 %v1121_v18  ;;  %v1155_v3 = vld [vmem:[#allocation2 + $0x1a0] sm:$0xff]   ;;  %v1159_v7 = vld [vmem:[#allocation2 + $0x1a8] sm:$0xff]   ;;  %v1161_v9 = vld [vmem:[#allocation2 + $0x1f0] sm:$0xff]  }
  0x27   :  { %1010 = vmatpush3.bf16.msra.mxu1 %v1122_v19  ;;  %989 = vmatprep.subr.bf16.mxu0 %v1123_v20  ;;  %v1162_v10 = vld [vmem:[#allocation2 + $0x130] sm:$0xff]   ;;  %v1164_v12 = vld [vmem:[#allocation2 + $0x178] sm:$0xff]   ;;  %v37_v15 = vld [vmem:[%s1332_s0 + $0x8] sm:$0xff] }
  0x28   :  { %1011 = vmatprep.subr.bf16.mxu1 %v1124_v21  ;;  %v1163_v11 = vld [vmem:[#allocation2 + $0x1b0] sm:$0xff]   ;;  %v1165_v13 = vld [vmem:[#allocation2 + $0x1f8] sm:$0xff]   ;;  %v64_v17 = vrot.slane %v37_v15, %v1278_v35  ;;  %v57_v18 = vcombine.high %v37_v15, %v37_v15 }
  0x29   :  { %v1166_v14 = vld [vmem:[#allocation2 + $0x138] sm:$0xff]   ;;  %v1171_v29 = vld [vmem:[%s1335_s3 + $0x10] sm:$0xff]  }
  0x2a   :  { %990 = vmatpush3.bf16.msra.mxu0 %v1125_v25  ;;  %v1167_v16 = vld [vmem:[#allocation2 + $0x1b8] sm:$0xff]   ;;  %v72_v19 = vcombine.high %v64_v17, %v64_v17  ;;  %v71_v20 = vrot.slane %v57_v18, %v1278_v35  ;;  %v86_v21 = vpack.c.bf16 %v64_v17, %v64_v17 }
  0x2b   :  { %1012 = vmatpush3.bf16.msra.mxu1 %v1126_v26  ;;  %991 = vmatprep.subr.bf16.mxu0 %v1127_v27  ;;  %v1169_v26 = vld [vmem:[%s1335_s3] sm:$0xff]   ;;  %v1233_v27 = vmov 0.0   ;;  %v1172_v30 = vld [vmem:[%s1335_s3 + $0x18] sm:$0xff]  }
  0x2c   :  { %1013 = vmatprep.subr.bf16.mxu1 %v1128_v28  ;;  %v87_v22 = vpack.c.bf16 %v72_v19, %v72_v19  ;;  %v73_v23 = vcombine.high %v71_v20, %v71_v20  ;;  %v88_v24 = vpack.c.bf16 %v71_v20, %v71_v20  ;;  %v1170_v28 = vld [vmem:[%s1335_s3 + $0x8] sm:$0xff]  }
  0x2e   :  { %992 = vmatpush3.bf16.msra.mxu0 %v1129_v31  ;;  %v89_v25 = vpack.c.bf16 %v73_v23, %v73_v23  ;;  %v1173_v31 = vld [vmem:[%s1335_s3 + $0x20] sm:$0xff]  }
  0x2f   :  { %1014 = vmatpush3.bf16.msra.mxu1 %v1130_v32  ;;  %993 = vmatprep.subr.bf16.mxu0 %v1131_v33  ;;  %v1174_v32 = vld [vmem:[%s1335_s3 + $0x28] sm:$0xff]   ;;  %v1175_v33 = vld [vmem:[%s1335_s3 + $0x30] sm:$0xff]  }
  0x30   :  { %1015 = vmatprep.subr.bf16.mxu1 %v1132_v34  ;;  %v1176_v34 = vld [vmem:[%s1335_s3 + $0x38] sm:$0xff]  }
  0x32   :  { %994 = vmatpush3.bf16.msra.mxu0 %v1133_v36  ;;  %v905_v36 = vld [vmem:[%s1334_s2] ss:$0 sm:$0xff] }
  0x33   :  { %1016 = vmatpush3.bf16.msra.mxu1 %v1134_v37  ;;  %1023 = vmatprep.subr.bf16.mxu0 %v1136_v41 }
  0x34   :  { %1045 = vmatprep.subr.bf16.mxu1 %v1137_v42 }
  0x35   :  { %642 = vmatmul.mubr.bf16.vlgmr.msra.gmra.mrb[0].mxu0 %v82_v45 }
  0x36   :  { %1024 = vmatpush3.bf16.msra.mxu0 %v1138_v46  ;;  %682 = vmatmul.mubr.bf16.vlgmr.msra.gmra.mrb[0].mxu1 %v84_v50 }
  0x37   :  { %1025 = vmatprep.subr.bf16.mxu0 %v1140_v51  ;;  %1046 = vmatpush3.bf16.msra.mxu1 %v1139_v49 }
  0x38   :  { %1047 = vmatprep.subr.bf16.mxu1 %v1141_v53  ;;  %721 = vmatprep.mubr.bf16.mxu0 %v87_v22 }
  0x39   :  { %761 = vmatprep.mubr.bf16.mxu1 %v89_v25 }
  0x3a   :  { %1026 = vmatpush3.bf16.msra.mxu0 %v1142_v54 }
  0x3b   :  { %1027 = vmatprep.subr.bf16.mxu0 %v1144_v56  ;;  %1048 = vmatpush3.bf16.msra.mxu1 %v1143_v55 }
  0x3c   :  { %1049 = vmatprep.subr.bf16.mxu1 %v1145_v57 }
  0x3e   :  { %1028 = vmatpush3.bf16.msra.mxu0 %v1146_v58 }
  0x3f   :  { %1029 = vmatprep.subr.bf16.mxu0 %v1148_v60  ;;  %1050 = vmatpush3.bf16.msra.mxu1 %v1147_v59 }
  0x40   :  { %1051 = vmatprep.subr.bf16.mxu1 %v1149_v61 }
  0x42   :  { %1030 = vmatpush3.bf16.msra.mxu0 %v1150_v62  ;;  %v970_v62 = vld [vmem:[%s1336_s4] ss:$0 sm:$0xff]  ;;  %s1207_s4 = scalar_lea.vmem %s897_s28, 32 }
  0x43   :  { %1031 = vmatprep.subr.bf16.mxu0 %v1152_v0  ;;  %1052 = vmatpush3.bf16.msra.mxu1 %v1151_v63  ;;  %p1209_p10 = scmp.lt.s32.totalorder %s1207_s4, %s1203_s29 }
  0x44   :  { %1053 = vmatprep.subr.bf16.mxu1 %v1153_v1 }
  0x45   :  { %p1210_p11 = por %p1209_p10, %p1208_p9 }
  0x46   :  { %1032 = vmatpush3.bf16.msra.mxu0 %v1154_v2 }
  0x47   :  { %1033 = vmatprep.subr.bf16.mxu0 %v1156_v4  ;;  %1054 = vmatpush3.bf16.msra.mxu1 %v1155_v3  ;;  %p1211_p12 = pnand %p1210_p11, %p1204_p8 }
  0x48   :  { %1055 = vmatprep.subr.bf16.mxu1 %v1157_v5 }
  0x4a   :  { %1034 = vmatpush3.bf16.msra.mxu0 %v1158_v6 }
  0x4b   :  { %1035 = vmatprep.subr.bf16.mxu0 %v1160_v8  ;;  %1056 = vmatpush3.bf16.msra.mxu1 %v1159_v7 }
  0x4c   :  { %1057 = vmatprep.subr.bf16.mxu1 %v1161_v9 }
  0x4e   :  { %1036 = vmatpush3.bf16.msra.mxu0 %v1162_v10 }
  0x4f   :  { %1037 = vmatprep.subr.bf16.mxu0 %v1164_v12  ;;  %1058 = vmatpush3.bf16.msra.mxu1 %v1163_v11 }
  0x50   :  { %1059 = vmatprep.subr.bf16.mxu1 %v1165_v13 }
  0x52   :  { %1038 = vmatpush3.bf16.msra.mxu0 %v1166_v14 }
  0x53   :  { %1060 = vmatpush3.bf16.msra.mxu1 %v1167_v16  ;;  %1076 = vmatprep.subr.bf16.mxu0 %v1233_v27 }
  0x55   :  { %722 = vmatmul.mubr.bf16.vlgmr.msra.gmra.mrb[4].mxu0 %v86_v21 }
  0x56   :  { %762 = vmatmul.mubr.bf16.vlgmr.msra.gmra.mrb[4].mxu1 %v88_v24  ;;  %1077 = vmatpush3.bf16.msra.mxu0 %v1169_v26 }
  0x57   :  { %1078 = vmatprep.subr.bf16.mxu0 %v1233_v27  ;;  %1092 = vmatprep.mubr.msk.bf16.mxu0 %vm1234_vm0, %v1233_v27 }
  0x5a   :  { %1079 = vmatpush3.bf16.msra.mxu0 %v1170_v28 }
  0x5b   :  { %1080 = vmatprep.subr.bf16.mxu0 %v1233_v27 }
  0x5e   :  { %1081 = vmatpush3.bf16.msra.mxu0 %v1171_v29 }
  0x5f   :  { %1082 = vmatprep.subr.bf16.mxu0 %v1233_v27 }
  0x62   :  { %1083 = vmatpush3.bf16.msra.mxu0 %v1172_v30 }
  0x63   :  { %1084 = vmatprep.subr.bf16.mxu0 %v1233_v27 }
  0x66   :  { %1085 = vmatpush3.bf16.msra.mxu0 %v1173_v31 }
  0x67   :  { %1086 = vmatprep.subr.bf16.mxu0 %v1233_v27 }
  0x6a   :  { %1087 = vmatpush3.bf16.msra.mxu0 %v1174_v32 }
  0x6b   :  { %1088 = vmatprep.subr.bf16.mxu0 %v1233_v27 }
  0x6e   :  { %1089 = vmatpush3.bf16.msra.mxu0 %v1175_v33 }
  0x6f   :  { %1090 = vmatprep.subr.bf16.mxu0 %v1233_v27 }
  0x72   :  { %1091 = vmatpush3.bf16.msra.mxu0 %v1176_v34 }
 0x108   :  { %v995_v35 = vpop.f32.mrb[0].mxu0 }
 0x109   :  { %v996_v37 = vpop.f32.mrb[1].mxu0  ;;  %v1017_v38 = vpop.f32.mrb[0].mxu1 }
 0x10a   :  { %v997_v39 = vadd.f32 %v996_v37, %v995_v35  ;;  %v998_v40 = vpop.f32.mrb[2].mxu0  ;;  %v1018_v41 = vpop.f32.mrb[1].mxu1 }
 0x10b   :  { %v999_v42 = vpop.f32.mrb[3].mxu0  ;;  %v1019_v44 = vadd.f32 %v1018_v41, %v1017_v38  ;;  %v1020_v45 = vpop.f32.mrb[2].mxu1 }
 0x10c   :  { %v644_v43 = vadd.f32 %v997_v39, %v905_v36  ;;  %v1021_v46 = vpop.f32.mrb[3].mxu1 }
 0x10e   :  { %v684_v47 = vadd.f32 %v1019_v44, %v644_v43 }
 0x128   :  { %v1039_v48 = vpop.f32.mrb[4].mxu0 }
 0x129   :  { %v1040_v49 = vpop.f32.mrb[5].mxu0  ;;  %v1061_v50 = vpop.f32.mrb[4].mxu1 }
 0x12a   :  { %v1041_v51 = vadd.f32 %v1040_v49, %v1039_v48  ;;  %v1042_v52 = vpop.f32.mrb[6].mxu0  ;;  %v1062_v53 = vpop.f32.mrb[5].mxu1 }
 0x12b   :  { %v1043_v54 = vpop.f32.mrb[7].mxu0  ;;  %v1063_v56 = vadd.f32 %v1062_v53, %v1061_v50  ;;  %v1064_v57 = vpop.f32.mrb[6].mxu1 }
 0x12c   :  { %v724_v55 = vadd.f32 %v1041_v51, %v684_v47  ;;  %v1065_v58 = vpop.f32.mrb[7].mxu1 }
 0x12e   :  { %v764_v59 = vadd.f32 %v1063_v56, %v724_v55 }
 0x130   :  { %v769_v60 = vmax.f32 %v764_v59, 0.0 }
 0x132   :  { %v770_v61 = vpack.c.bf16 %v769_v60, %v769_v60 }
 0x134   :  { %1093 = vmatmul.mubr.bf16.vlgmr.msra.gmra.mrb[8].mxu0 %v770_v61 }
 0x207   :  { %v876_v63 = vpop.f32.mrb[8].mxu0 }
 0x208   :  { %v877_v0 = vadd.f32 %v970_v62, %v876_v63  ;;  %v1094_v1 = vpop.f32.mrb[9].mxu0 }
 0x209   :  { %v879_v2 = vpop.f32.mrb[10].mxu0 }
 0x20a   :  { %v882_v3 = vsub.f32 0.0, %v877_v0  ;;  %v1095_v4 = vpop.f32.mrb[11].mxu0 }
 0x20c   :  { %v883_v5 = vmul.f32 1.442695, %v882_v3 }
 0x20e   :  { %1177 = vpow2.f32 %v883_v5 }
 0x218   :  { %v1178_v6 = vpop.eup %1177 }
 0x219   :  { %v885_v7 = vadd.f32 1.0, %v1178_v6 }
 0x21b   :  { %1179 = vrcp.f32 %v885_v7 }
 0x225   :  { %v1180_v8 = vpop.eup %1179 }
 0x226   :  { %v888_v9 = vpack.c.bf16 %v1180_v8, %v1180_v8 }
 0x228   :  { %889 = vst [vmem:[#allocation5] sm:$0x1] %v888_v9 }
 0x229   :  { %1214 = shalt.err (!%p1211_p12)
}
 0x22a   :  { %s1215_s1 = scalar_lea.hbm %s1337_s5, 16 }
 0x22b   :  { %p1216_p13 = scmp.ne.s32.totalorder %s1337_s5, %s1215_s1  ;;  %p1219_p0 = scmp.lt.u32.totalorder %s1215_s1, %s1337_s5 }
 0x22d   :  { %p1221_p1 = pnand %p1219_p0, %p1216_p13 }
 0x22f   :  { %1224 = shalt.err (!%p1221_p1)
}
 0x230   :  { %899 = dma.vmem_to_hbm [thread:$0]  %s897_s28, 16, %s1337_s5, [#allocation4]  }
 0x231   :  { %1227 = dma.done.wait [#allocation4], 16  }
 0x232   :  { %1228 = vsyncadd [#allocation4], 4294967280 }
 0x233   :  { %903 = vsyncpa [#allocation3], 1 }
 0x234   :  { %904 = vsyncpa [#allocation4], 1 }

</bundles_post_ra>
